<compile_context>
chip_gen: v6e
topology: v6e:2x2x1
jax: 0.10.0
libtpu: 0.0.40
codegen_flags: <defaults>
</compile_context>

<pallas_src>
import jax
import jax.numpy as jnp
from jax import lax
from jax.experimental import pallas as pl
from jax.experimental.pallas import tpu as pltpu

_MIB = 1024 * 1024
# Conservative raw working-set budget: fits v7x's 64 MiB physical VMEM with >=25%
# headroom and is well inside v5e/v6e's 128 MiB.  Scoped limit is raised explicitly.
_VMEM_WS_BUDGET = 40 * _MIB
_VMEM_LIMIT_CAP = 56 * _MIB


def _round_up(x, m):
    return (x + m - 1) // m * m


def _cdiv(a, b):
    return -(-a // b)


def _vmem_limit(ws_bytes):
    """Scoped-VMEM limit: 50% headroom over the working set, clamped under v7x physical."""
    return int(min(max(ws_bytes * 3 // 2, 16 * _MIB), _VMEM_LIMIT_CAP))


# --------------------------------------------------------------------------------------
# Stage 1 (cold, once per task): fold the attention softmax into the linear layer.
# --------------------------------------------------------------------------------------
def sel_weight_kernel(task_ref, wlin_t_ref, blin_ref, watt_ref, batt_ref,
                      weff_ref, beff_ref):
    """Per-grid-step: one out_pad column block of W_eff / b_eff.

    task_ref   : SMEM (1,)                     task scalar (scalar prefetch)
    wlin_t_ref : VMEM (in_depth, full_depth)   W_lin.T (resident)
    blin_ref   : VMEM (1, full_depth)          b_lin   (resident)
    watt_ref   : VMEM (tile_o, full_depth)     W_att[:, 0] rows (zero-padded rows at tail)
    batt_ref   : VMEM (tile_o, full_depth)     b_att rows       (zero-padded rows at tail)
    weff_ref   : VMEM (in_depth, tile_o)       out: W_lin.T @ w.T column block
    beff_ref   : VMEM (1, tile_o)              out: b_lin  @ w.T column block
    """
    t = task_ref[0]
    logits = (t * watt_ref[...] + batt_ref[...]) * 100.0
    m = jnp.max(logits, axis=-1, keepdims=True)
    e = jnp.exp(logits - m)
    w = e / jnp.sum(e, axis=-1, keepdims=True)  # exact divide: once per task, keeps 1e-4 tol

    # Contract the shared full_depth axis directly.  (Cold path: any internal RHS
    # transpose Mosaic emits here is paid once per task, never per batch.)
    dnums = (((1,), (1,)), ((), ()))
    weff_ref[...] = lax.dot_general(wlin_t_ref[...], w, dnums,
                                    preferred_element_type=jnp.float32)
    beff_ref[...] = lax.dot_general(blin_ref[...], w, dnums,
                                    preferred_element_type=jnp.float32)


def precompute_sel_weights(task, w_lin, b_lin, w_att, b_att, out_depth, full_depth,
                           *, tile_o=512):
    """Batch-independent precompute.  Cache the result per task and reuse it across calls.

    Returns:
      weff: (in_depth, out_pad) f32,  beff: (1, out_pad) f32, out_pad = round_up(out_depth, 128).
    """
    full_depth_chk, in_depth = w_lin.shape
    assert full_depth_chk == full_depth
    out_pad = _round_up(out_depth, 128)

    # Layout plumbing (cold path only — no longer re-done per forward call).
    wlin_t = jnp.transpose(w_lin).astype(jnp.float32)            # (in_depth, full_depth)
    blin_2d = b_lin.reshape(1, full_depth).astype(jnp.float32)
    watt_2d = w_att[:, 0].reshape(out_depth, full_depth).astype(jnp.float32)
    batt_2d = b_att.reshape(out_depth, full_depth).astype(jnp.float32)
    pad_rows = out_pad - out_depth
    if pad_rows:
        # Zero rows -> uniform softmax -> finite garbage columns that callers slice off.
        watt_2d = jnp.pad(watt_2d, ((0, pad_rows), (0, 0)))
        batt_2d = jnp.pad(batt_2d, ((0, pad_rows), (0, 0)))
    task_arr = jnp.asarray([task], dtype=jnp.float32)

    # Tile over out_pad so large out_depth*full_depth stays within the VMEM budget.
    def ws1(t_o):
        return (2 * in_depth * full_depth * 4      # W_lin.T (default double-buffered)
                + 2 * full_depth * 4               # b_lin
                + 4 * t_o * full_depth * 4         # watt + batt blocks (double-buffered)
                + 2 * in_depth * t_o * 4           # weff out block (double-buffered)
                + 2 * t_o * 4                      # beff out block
                + 4 * t_o * full_depth * 4)        # softmax temporaries

    n128 = out_pad // 128
    target = min(_round_up(max(tile_o, 128), 128), out_pad)
    tile_o_eff = 128
    for d in range(1, n128 + 1):                   # tile_o must evenly divide out_pad
        if n128 % d == 0:
            cand = d * 128
            if cand <= target and ws1(cand) <= _VMEM_WS_BUDGET:
                tile_o_eff = max(tile_o_eff, cand)

    grid1 = (out_pad // tile_o_eff,)
    weff, beff = pl.pallas_call(
        sel_weight_kernel,
        out_shape=(jax.ShapeDtypeStruct((in_depth, out_pad), jnp.float32),
                   jax.ShapeDtypeStruct((1, out_pad), jnp.float32)),
        grid_spec=pltpu.PrefetchScalarGridSpec(
            num_scalar_prefetch=1,                              # task scalar -> SMEM
            grid=grid1,
            in_specs=[
                pl.BlockSpec((in_depth, full_depth), lambda j, task: (0, 0)),  # W_lin.T
                pl.BlockSpec((1, full_depth), lambda j, task: (0, 0)),         # b_lin
                pl.BlockSpec((tile_o_eff, full_depth), lambda j, task: (j, 0)),  # W_att rows
                pl.BlockSpec((tile_o_eff, full_depth), lambda j, task: (j, 0)),  # b_att rows
            ],
            out_specs=(pl.BlockSpec((in_depth, tile_o_eff), lambda j, task: (0, j)),
                       pl.BlockSpec((1, tile_o_eff), lambda j, task: (0, j))),
        ),
        compiler_params=pltpu.CompilerParams(
            dimension_semantics=("parallel",),
            vmem_limit_bytes=_vmem_limit(ws1(tile_o_eff)),
        ),
    )(task_arr, wlin_t, blin_2d, watt_2d, batt_2d)
    return weff, beff


# --------------------------------------------------------------------------------------
# Stage 2 (hot, per batch): out = z @ W_eff + b_eff
# --------------------------------------------------------------------------------------
def sel_gemm_kernel(z_ref, weff_ref, beff_ref, out_ref):
    """One MXU GEMM + bias per batch tile."""
    out_ref[...] = (
        jnp.dot(z_ref[...], weff_ref[...], preferred_element_type=jnp.float32)
        + beff_ref[...]
    ).astype(out_ref.dtype)


def sel_linear_apply(z, weff, beff, out_depth, *, tile_b=512,
                     use_bf16_matmul=False, trim_output=True):
    """Hot path.  `weff`/`beff` come from precompute_sel_weights (cache them per task)."""
    B, in_depth = z.shape
    in_depth_w, out_pad = weff.shape
    assert in_depth_w == in_depth

    if use_bf16_matmul:
        # bf16 MXU operands (f32 accumulate) halve the dominant z HBM read.  Accuracy
        # policy (not hardware) gates this; prefer producers handing z in bf16 already.
        z_mm = z.astype(jnp.bfloat16)
        weff_mm = weff.astype(jnp.bfloat16)
        row_align, z_item, w_item = 16, 2, 2       # bf16 packs two rows per sublane
    else:
        z_mm = z.astype(jnp.float32)
        weff_mm = weff
        row_align, z_item, w_item = 8, 4, 4

    # ---- batch tiling: VMEM-budgeted cap, balanced tiles, >=2 tiles when B permits ----
    weights_bytes = 2 * (in_depth * out_pad * w_item + out_pad * 4)  # worst case (double-buffered)
    per_row_bytes = 2 * (in_depth * z_item + out_pad * 4)            # z tile + out tile, double-buffered
    avail = _VMEM_WS_BUDGET - weights_bytes
    if avail > per_row_bytes * row_align:
        cap_rows = (avail // per_row_bytes) // row_align * row_align
    else:
        cap_rows = row_align
    tile_b_eff = max(row_align, min(_round_up(tile_b, row_align), cap_rows))

    n_tiles = _cdiv(B, tile_b_eff)
    if B >= 256:
        n_tiles = max(n_tiles, 2)                  # keep both v7x TensorCores busy
    tile_b_eff = _round_up(_cdiv(B, n_tiles), row_align)   # balanced tiles, no 2x tail padding
    b_padded = n_tiles * tile_b_eff
    if b_padded != B:
        z_mm = jnp.pad(z_mm, ((0, b_padded - B), (0, 0)))

    ws_bytes = weights_bytes + tile_b_eff * per_row_bytes

    def _run(single_buffer_weights):
        if single_buffer_weights:
            # Constant index_map -> one resident copy is enough; reclaim the 2x buffer.
            weff_spec = pl.BlockSpec((in_depth, out_pad), lambda i: (0, 0),
                                     pipeline_mode=pl.Buffered(1))
            beff_spec = pl.BlockSpec((1, out_pad), lambda i: (0, 0),
                                     pipeline_mode=pl.Buffered(1))
        else:
            weff_spec = pl.BlockSpec((in_depth, out_pad), lambda i: (0, 0))
            beff_spec = pl.BlockSpec((1, out_pad), lambda i: (0, 0))
        return pl.pallas_call(
            sel_gemm_kernel,
            out_shape=jax.ShapeDtypeStruct((b_padded, out_pad), jnp.float32),
            grid_spec=pltpu.PrefetchScalarGridSpec(
                num_scalar_prefetch=0,
                grid=(n_tiles,),
                in_specs=[
                    pl.BlockSpec((tile_b_eff, in_depth), lambda i: (i, 0)),  # z tile (pipelined)
                    weff_spec,                                               # W_eff (resident)
                    beff_spec,                                               # b_eff (resident)
                ],
                out_specs=pl.BlockSpec((tile_b_eff, out_pad), lambda i: (i, 0)),
            ),
            compiler_params=pltpu.CompilerParams(
                dimension_semantics=("parallel",),       # shard batch tiles across v7x TCs
                vmem_limit_bytes=_vmem_limit(ws_bytes),  # don't let scoped default gate tile_b
            ),
        )(z_mm, weff_mm, beff)

    try:
        out_padded = _run(single_buffer_weights=True)
    except Exception:
        # Fallback for JAX versions without pipeline_mode=pl.Buffered(1): plain
        # constant-index-map (double-buffered) resident weights — still correct.
        out_padded = _run(single_buffer_weights=False)

    if trim_output:
        return out_padded[:B, :out_depth]
    # Consumers that can read padded/lane-dense output avoid an extra HBM pass.
    return out_padded


def sel_linear_forward(z, task, w_lin, b_lin, w_att, b_att, out_depth, full_depth,
                       *, tile_b=512, use_bf16_matmul=False):
    """Convenience one-shot wrapper.  For repeated calls with the same task, cache the
    result of precompute_sel_weights() and call sel_linear_apply() directly."""
    weff, beff = precompute_sel_weights(task, w_lin, b_lin, w_att, b_att,
                                        out_depth, full_depth)
    return sel_linear_apply(z, weff, beff, out_depth,
                            tile_b=tile_b, use_bf16_matmul=use_bf16_matmul)


def sel_linear_reference(z, task, w_lin, b_lin, w_att, b_att, out_depth, full_depth):
    """Pure-JAX reference mirroring the PyTorch forward exactly."""
    B = z.shape[0]
    y = z @ w_lin.T + b_lin                                   # (B, full_depth)
    task_col = jnp.full((B, 1), task, dtype=jnp.float32)
    w = task_col @ w_att.T + b_att                            # (B, out*full)
    w = w.reshape(B, out_depth, full_depth)
    w = jax.nn.softmax(w * 100.0, axis=-1)
    out = jnp.einsum("bof,bf->bo", w, y)                      # bmm(w, y[:, :, None])
    return out


if __name__ == "__main__":
    key = jax.random.PRNGKey(0)
    k1, k2, k3, k4, k5, k6 = jax.random.split(key, 6)

    in_depth, full_depth, out_depth = 32, 16, 8
    task = 1.0

    # nn.Linear(in_depth, full_depth): weight (full_depth, in_depth), bias (full_depth,)
    w_lin = jax.random.normal(k2, (full_depth, in_depth), dtype=jnp.float32) * 0.1
    b_lin = jax.random.normal(k3, (full_depth,), dtype=jnp.float32) * 0.1
    # nn.Linear(1, out_depth*full_depth): weight (out*full, 1), bias (out*full,)
    w_att = jax.random.normal(k4, (out_depth * full_depth, 1), dtype=jnp.float32) * 0.1
    b_att = jax.random.normal(k5, (out_depth * full_depth,), dtype=jnp.float32) * 0.1

    # Once-per-task fold, hoisted out of the per-batch hot path (cache this per task).
    weff, beff = jax.block_until_ready(
        precompute_sel_weights(task, w_lin, b_lin, w_att, b_att, out_depth, full_depth))

    ok = True
    # Small batch + a larger ragged batch that exercises the balanced multi-tile grid.
    for kz, B in ((k1, 8), (k6, 300)):
        z = jax.random.normal(kz, (B, in_depth), dtype=jnp.float32)
        out = jax.block_until_ready(sel_linear_apply(z, weff, beff, out_depth))
        ref = sel_linear_reference(z, task, w_lin, b_lin, w_att, b_att,
                                   out_depth, full_depth)
        ok = ok and (out.shape == (B, out_depth))
        ok = ok and bool(jnp.allclose(out, ref, atol=1e-4, rtol=1e-4))

    # One-shot convenience wrapper must match as well.
    z = jax.random.normal(k1, (8, in_depth), dtype=jnp.float32)
    out2 = jax.block_until_ready(
        sel_linear_forward(z, task, w_lin, b_lin, w_att, b_att, out_depth, full_depth))
    ok = ok and bool(jnp.allclose(
        out2,
        sel_linear_reference(z, task, w_lin, b_lin, w_att, b_att, out_depth, full_depth),
        atol=1e-4, rtol=1e-4))

    assert ok, "Pallas kernel mismatch vs reference"
    print("KERNEL_OK")
</pallas_src>

<mosaic_0001>
module attributes {stable_mosaic.version = 11 : i64} {
  func.func @sel_weight_kernel(%arg0: i32, %arg1: memref<1xf32, #tpu.memory_space<smem>>, %arg2: memref<32x16xf32, #tpu.memory_space<vmem>>, %arg3: memref<1x16xf32, #tpu.memory_space<vmem>>, %arg4: memref<128x16xf32, #tpu.memory_space<vmem>>, %arg5: memref<128x16xf32, #tpu.memory_space<vmem>>, %arg6: memref<32x128xf32, #tpu.memory_space<vmem>>, %arg7: memref<1x128xf32, #tpu.memory_space<vmem>>) attributes {dimension_semantics = [#tpu.dimension_semantics<parallel>], iteration_bounds = array<i64: 1>, scalar_prefetch = 1 : i64, scratch_operands = 0 : i64, tpu.core_type = #tpu.core_type<tc>, window_params = [{pipeline_mode = #tpu.pipeline_mode<synchronous>, transform_indices = @transform_0, window_bounds = array<i64: 32, 16>}, {pipeline_mode = #tpu.pipeline_mode<synchronous>, transform_indices = @transform_1, window_bounds = array<i64: 1, 16>}, {transform_indices = @transform_2, window_bounds = array<i64: 128, 16>}, {transform_indices = @transform_3, window_bounds = array<i64: 128, 16>}, {transform_indices = @transform_4, window_bounds = array<i64: 32, 128>}, {transform_indices = @transform_5, window_bounds = array<i64: 1, 128>}]} {
    %c0 = arith.constant 0 : index
    %0 = memref.load %arg1[%c0] : memref<1xf32, #tpu.memory_space<smem>>
    %c0_0 = arith.constant 0 : index
    %c0_1 = arith.constant 0 : index
    %1 = vector.load %arg4[%c0_0, %c0_1] : memref<128x16xf32, #tpu.memory_space<vmem>>, vector<128x16xf32>
    %2 = vector.broadcast %0 : f32 to vector<128x16xf32>
    %3 = arith.mulf %2, %1 : vector<128x16xf32>
    %c0_2 = arith.constant 0 : index
    %c0_3 = arith.constant 0 : index
    %4 = vector.load %arg5[%c0_2, %c0_3] : memref<128x16xf32, #tpu.memory_space<vmem>>, vector<128x16xf32>
    %5 = arith.addf %3, %4 : vector<128x16xf32>
    %cst = arith.constant 1.000000e+02 : f32
    %6 = vector.broadcast %cst : f32 to vector<128x16xf32>
    %7 = arith.mulf %5, %6 : vector<128x16xf32>
    %cst_4 = arith.constant dense<0xFF800000> : vector<128xf32>
    %8 = vector.multi_reduction <maximumf>, %7, %cst_4 [1] : vector<128x16xf32> to vector<128xf32>
    %9 = vector.shape_cast %8 : vector<128xf32> to vector<128x1xf32>
    %10 = vector.broadcast %9 : vector<128x1xf32> to vector<128x16xf32>
    %11 = arith.subf %7, %10 : vector<128x16xf32>
    %12 = math.exp %11 : vector<128x16xf32>
    %cst_5 = arith.constant dense<0.000000e+00> : vector<128xf32>
    %13 = vector.multi_reduction <add>, %12, %cst_5 [1] : vector<128x16xf32> to vector<128xf32>
    %14 = vector.shape_cast %13 : vector<128xf32> to vector<128x1xf32>
    %15 = vector.broadcast %14 : vector<128x1xf32> to vector<128x16xf32>
    %16 = arith.divf %12, %15 : vector<128x16xf32>
    %c0_6 = arith.constant 0 : index
    %c0_7 = arith.constant 0 : index
    %17 = vector.load %arg2[%c0_6, %c0_7] : memref<32x16xf32, #tpu.memory_space<vmem>>, vector<32x16xf32>
    %cst_8 = arith.constant dense<0.000000e+00> : vector<32x128xf32>
    %18 = tpu.matmul %17, %16, %cst_8 {dimension_numbers = #tpu.dot_dimension_numbers<[1], [1], [0], [0], [0, 0, 1, 0], [], []>} : vector<32x16xf32>, vector<128x16xf32>, vector<32x128xf32> -> vector<32x128xf32>
    %c0_9 = arith.constant 0 : index
    %c0_10 = arith.constant 0 : index
    %19 = vector.load %arg6[%c0_9, %c0_10] : memref<32x128xf32, #tpu.memory_space<vmem>>, vector<32x128xf32>
    tpu.vector_store %arg6[%c0_9, %c0_10], %18 {strides = array<i32>} : memref<32x128xf32, #tpu.memory_space<vmem>>, vector<32x128xf32>,
    %c0_11 = arith.constant 0 : index
    %c0_12 = arith.constant 0 : index
    %20 = vector.load %arg3[%c0_11, %c0_12] : memref<1x16xf32, #tpu.memory_space<vmem>>, vector<1x16xf32>
    %cst_13 = arith.constant dense<0.000000e+00> : vector<1x128xf32>
    %21 = tpu.matmul %20, %16, %cst_13 {dimension_numbers = #tpu.dot_dimension_numbers<[1], [1], [0], [0], [0, 0, 1, 0], [], []>} : vector<1x16xf32>, vector<128x16xf32>, vector<1x128xf32> -> vector<1x128xf32>
    %c0_14 = arith.constant 0 : index
    %c0_15 = arith.constant 0 : index
    %22 = vector.load %arg7[%c0_14, %c0_15] : memref<1x128xf32, #tpu.memory_space<vmem>>, vector<1x128xf32>
    tpu.vector_store %arg7[%c0_14, %c0_15], %21 {strides = array<i32>} : memref<1x128xf32, #tpu.memory_space<vmem>>, vector<1x128xf32>,
    return
  }
  func.func @transform_0(%arg0: i32, %arg1: memref<1xf32, #tpu.memory_space<smem>>) -> (i32, i32) {
    %c0_i32 = arith.constant 0 : i32
    %c0_i32_0 = arith.constant 0 : i32
    %c0_i32_1 = arith.constant 0 : i32
    return %c0_i32, %c0_i32_0 : i32, i32
  }
  func.func @transform_1(%arg0: i32, %arg1: memref<1xf32, #tpu.memory_space<smem>>) -> (i32, i32) {
    %c0_i32 = arith.constant 0 : i32
    %c0_i32_0 = arith.constant 0 : i32
    %c0_i32_1 = arith.constant 0 : i32
    return %c0_i32, %c0_i32_0 : i32, i32
  }
  func.func @transform_2(%arg0: i32, %arg1: memref<1xf32, #tpu.memory_space<smem>>) -> (i32, i32) {
    %c0_i32 = arith.constant 0 : i32
    %c0_i32_0 = arith.constant 0 : i32
    return %arg0, %c0_i32 : i32, i32
  }
  func.func @transform_3(%arg0: i32, %arg1: memref<1xf32, #tpu.memory_space<smem>>) -> (i32, i32) {
    %c0_i32 = arith.constant 0 : i32
    %c0_i32_0 = arith.constant 0 : i32
    return %arg0, %c0_i32 : i32, i32
  }
  func.func @transform_4(%arg0: i32, %arg1: memref<1xf32, #tpu.memory_space<smem>>) -> (i32, i32) {
    %c0_i32 = arith.constant 0 : i32
    %c0_i32_0 = arith.constant 0 : i32
    return %c0_i32, %arg0 : i32, i32
  }
  func.func @transform_5(%arg0: i32, %arg1: memref<1xf32, #tpu.memory_space<smem>>) -> (i32, i32) {
    %c0_i32 = arith.constant 0 : i32
    %c0_i32_0 = arith.constant 0 : i32
    return %c0_i32, %arg0 : i32, i32
  }
}

</mosaic_0001>

<bundles_post_ra>
// kernel: tpu_custom_call.1
= control target key start
LH: loop header
LB: loop body
LE: loop exit
PB: predicated region body
PF: predicated region fallthrough
CT: control target
= control target key end

     0   :  { %13 = vsyncpa [#allocation5], 0  ;;  %vm105_vm0 = vcmask 130048   ;;  %s1210_s0 = inlined_call_operand.<no memory space> [shape: f32[1], index: 0, kind: input, shape index: {}]   ;;  %s1211_s1 = inlined_call_operand.vmem [shape: f32[32,16], index: 1, kind: input, shape index: {}]   ;;  %s1212_s2 = inlined_call_operand.vmem [shape: f32[1,16], index: 2, kind: input, shape index: {}]   ;;  %s1213_s3 = inlined_call_operand.vmem [shape: f32[128,16], index: 3, kind: input, shape index: {}]   ;;  %s1214_s4 = inlined_call_operand.vmem [shape: f32[128,16], index: 4, kind: input, shape index: {}]   ;;  %s1215_s5 = inlined_call_operand.hbm [shape: f32[32,128], index: 5, kind: output, shape index: {0}]   ;;  %s1216_s6 = inlined_call_operand.hbm [shape: f32[1,128], index: 6, kind: output, shape index: {1}]  }
   0x1   :  { %v39_v0 = vld [vmem:[%s1213_s3 + $0x78] sm:$0xff]  ;;  %v848_v1 = vstv %s1210_s0  ;;  %v38_v3 = vld [vmem:[%s1213_s3 + $0x70] sm:$0xff]  ;;  %v37_v7 = vld [vmem:[%s1213_s3 + $0x68] sm:$0xff] }
   0x2   :  { %v72_v2 = vld [vmem:[%s1214_s4 + $0x78] sm:$0xff]  ;;  %v56_v4 = vmul.f32 %v848_v1, %v39_v0  ;;  %v55_v5 = vmul.f32 %v848_v1, %v38_v3  ;;  %v71_v6 = vld [vmem:[%s1214_s4 + $0x70] sm:$0xff]  ;;  %v70_v8 = vld [vmem:[%s1214_s4 + $0x68] sm:$0xff]  ;;  %v54_v9 = vmul.f32 %v848_v1, %v37_v7 }
   0x3   :  { %v36_v10 = vld [vmem:[%s1213_s3 + $0x60] sm:$0xff]  ;;  %v35_v12 = vld [vmem:[%s1213_s3 + $0x58] sm:$0xff]  ;;  %v34_v18 = vld [vmem:[%s1213_s3 + $0x50] sm:$0xff] }
   0x4   :  { %v69_v11 = vld [vmem:[%s1214_s4 + $0x60] sm:$0xff]  ;;  %v88_v13 = vadd.f32 %v72_v2, %v56_v4  ;;  %v87_v14 = vadd.f32 %v71_v6, %v55_v5  ;;  %v53_v15 = vmul.f32 %v848_v1, %v36_v10  ;;  %v52_v16 = vmul.f32 %v848_v1, %v35_v12  ;;  %v68_v17 = vld [vmem:[%s1214_s4 + $0x58] sm:$0xff]  ;;  %v67_v19 = vld [vmem:[%s1214_s4 + $0x50] sm:$0xff] }
   0x5   :  { %v86_v20 = vadd.f32 %v70_v8, %v54_v9  ;;  %v51_v21 = vmul.f32 %v848_v1, %v34_v18  ;;  %v33_v22 = vld [vmem:[%s1213_s3 + $0x48] sm:$0xff]  ;;  %v32_v23 = vld [vmem:[%s1213_s3 + $0x40] sm:$0xff]  ;;  %v31_v33 = vld [vmem:[%s1213_s3 + $0x38] sm:$0xff] }
   0x6   :  { %v895_v24 = vmul.f32 100.0, %v88_v13  ;;  %v897_v25 = vmul.f32 100.0, %v87_v14  ;;  %v85_v26 = vadd.f32 %v69_v11, %v53_v15  ;;  %v84_v27 = vadd.f32 %v68_v17, %v52_v16  ;;  %v66_v31 = vld [vmem:[%s1214_s4 + $0x48] sm:$0xff]  ;;  %v65_v36 = vld [vmem:[%s1214_s4 + $0x40] sm:$0xff]  ;;  %v30_v37 = vld [vmem:[%s1213_s3 + $0x30] sm:$0xff] }
   0x7   :  { %v899_v28 = vmul.f32 100.0, %v86_v20  ;;  %v83_v29 = vadd.f32 %v67_v19, %v51_v21  ;;  %v50_v30 = vmul.f32 %v848_v1, %v33_v22  ;;  %v49_v32 = vmul.f32 %v848_v1, %v32_v23  ;;  %v64_v46 = vld [vmem:[%s1214_s4 + $0x38] sm:$0xff]  ;;  %v29_v48 = vld [vmem:[%s1213_s3 + $0x28] sm:$0xff]  ;;  %v63_v49 = vld [vmem:[%s1214_s4 + $0x30] sm:$0xff] }
   0x8   :  { %v151_v34 = vsel %vm105_vm0, %v895_v24, -inf  ;;  %v911_v35 = vmul.f32 100.0, %v85_v26  ;;  %v148_v39 = vsel %vm105_vm0, %v897_v25, -inf  ;;  %v923_v40 = vmul.f32 100.0, %v84_v27  ;;  %v28_v50 = vld [vmem:[%s1213_s3 + $0x20] sm:$0xff] }
   0x9   :  { %152 = vmax.xlane.f32.xlu0 %v151_v34  ;;  %v145_v38 = vsel %vm105_vm0, %v899_v28, -inf  ;;  %v82_v41 = vadd.f32 %v66_v31, %v50_v30  ;;  %v48_v42 = vmul.f32 %v848_v1, %v31_v33  ;;  %v928_v44 = vmul.f32 100.0, %v83_v29 }
   0xa   :  { %146 = vmax.xlane.f32.xlu1 %v145_v38  ;;  %v142_v43 = vsel %vm105_vm0, %v911_v35, -inf  ;;  %v81_v45 = vadd.f32 %v65_v36, %v49_v32  ;;  %v47_v47 = vmul.f32 %v848_v1, %v30_v37 }
   0xb   :  { %14 = vsyncpa [#allocation7], 0  ;;  %v139_v51 = vsel %vm105_vm0, %v923_v40, -inf  ;;  %v945_v52 = vmul.f32 100.0, %v82_v41  ;;  %v80_v53 = vadd.f32 %v64_v46, %v48_v42  ;;  %v46_v54 = vmul.f32 %v848_v1, %v29_v48  ;;  %v62_v58 = vld [vmem:[%s1214_s4 + $0x28] sm:$0xff]  ;;  %v27_v60 = vld [vmem:[%s1213_s3 + $0x18] sm:$0xff] }
   0xc   :  { %v136_v55 = vsel %vm105_vm0, %v928_v44, -inf  ;;  %v950_v56 = vmul.f32 100.0, %v81_v45  ;;  %v79_v57 = vadd.f32 %v63_v49, %v47_v47  ;;  %v45_v59 = vmul.f32 %v848_v1, %v28_v50  ;;  %v61_v61 = vld [vmem:[%s1214_s4 + $0x20] sm:$0xff]  ;;  %v26_v62 = vld [vmem:[%s1213_s3 + $0x10] sm:$0xff]  ;;  %v60_v7 = vld [vmem:[%s1214_s4 + $0x18] sm:$0xff]  ;;  %s804_s21 = smov [#allocation4]  }
   0xd   :  { %149 = vmax.xlane.f32.xlu0 %v148_v39  ;;  %v133_v63 = vsel %vm105_vm0, %v945_v52, -inf  ;;  %v967_v0 = vmul.f32 100.0, %v80_v53  ;;  %v78_v2 = vadd.f32 %v62_v58, %v46_v54  ;;  %v44_v3 = vmul.f32 %v848_v1, %v27_v60  ;;  %v25_v9 = vld [vmem:[%s1213_s3 + $0x8] sm:$0xff]  ;;  %v59_v10 = vld [vmem:[%s1214_s4 + $0x10] sm:$0xff]  ;;  %v24_v11 = vld [vmem:[%s1213_s3] sm:$0xff]  ;;  %s515_s22 = sshll.u32 %s804_s21, 4  ;;  %s516_s22 = int_to_ptr.vmem [resolvable:$true] %s515_s22 }
   0xe   :  { %143 = vmax.xlane.f32.xlu1 %v142_v43  ;;  %v130_v4 = vsel %vm105_vm0, %v950_v56, -inf  ;;  %v972_v5 = vmul.f32 100.0, %v79_v57  ;;  %v77_v6 = vadd.f32 %v61_v61, %v45_v59  ;;  %v43_v8 = vmul.f32 %v848_v1, %v26_v62  ;;  %v58_v19 = vld [vmem:[%s1214_s4 + $0x8] sm:$0xff]  ;;  %v57_v21 = vld [vmem:[%s1214_s4] sm:$0xff] }
   0xf   :  { %v127_v12 = vsel %vm105_vm0, %v967_v0, -inf  ;;  %v989_v13 = vmul.f32 100.0, %v78_v2  ;;  %v76_v14 = vadd.f32 %v60_v7, %v44_v3  ;;  %v42_v15 = vmul.f32 %v848_v1, %v25_v9 }
  0x10   :  { %v124_v16 = vsel %vm105_vm0, %v972_v5, -inf  ;;  %v994_v17 = vmul.f32 100.0, %v77_v6  ;;  %v75_v18 = vadd.f32 %v59_v10, %v43_v8  ;;  %v41_v20 = vmul.f32 %v848_v1, %v24_v11 }
  0x11   :  { %140 = vmax.xlane.f32.xlu0 %v139_v51  ;;  %v121_v22 = vsel %vm105_vm0, %v989_v13, -inf  ;;  %v1005_v23 = vmul.f32 100.0, %v76_v14  ;;  %v74_v26 = vadd.f32 %v58_v19, %v42_v15  ;;  %vm802_vm1 = vmmov 0  }
  0x12   :  { %137 = vmax.xlane.f32.xlu1 %v136_v55  ;;  %v118_v27 = vsel %vm105_vm0, %v994_v17, -inf  ;;  %v1009_v29 = vmul.f32 100.0, %v75_v18  ;;  %v73_v30 = vadd.f32 %v57_v21, %v41_v20 }
  0x13   :  { %v115_v1 = vsel %vm105_vm0, %v1005_v23, -inf  ;;  %v1013_v31 = vmul.f32 100.0, %v74_v26 }
  0x14   :  { %v112_v32 = vsel %vm105_vm0, %v1009_v29, -inf  ;;  %v1017_v33 = vmul.f32 100.0, %v73_v30 }
  0x15   :  { %134 = vmax.xlane.f32.xlu0 %v133_v63  ;;  %v109_v34 = vsel %vm105_vm0, %v1013_v31, -inf }
  0x16   :  { %131 = vmax.xlane.f32.xlu1 %v130_v4  ;;  %v106_v36 = vsel %vm105_vm0, %v1017_v33, -inf }
  0x19   :  { %128 = vmax.xlane.f32.xlu0 %v127_v12 }
  0x1a   :  { %125 = vmax.xlane.f32.xlu1 %v124_v16 }
  0x1d   :  { %122 = vmax.xlane.f32.xlu0 %v121_v22 }
  0x1e   :  { %119 = vmax.xlane.f32.xlu1 %v118_v27 }
  0x21   :  { %116 = vmax.xlane.f32.xlu0 %v115_v1 }
  0x22   :  { %113 = vmax.xlane.f32.xlu1 %v112_v32 }
  0x25   :  { %110 = vmax.xlane.f32.xlu0 %v109_v34 }
  0x26   :  { %107 = vmax.xlane.f32.xlu1 %v106_v36 }
  0x92   :  { %v153_v37 = vpop.xlane.xlu0 %152 }
  0x93   :  { %v169_v38 = vsub.f32 %v895_v24, %v153_v37  ;;  %v147_v39 = vpop.xlane.xlu1 %146 }
  0x94   :  { %v167_v41 = vsub.f32 %v899_v28, %v147_v39 }
  0x95   :  { %v200_v42 = vmul.f32 1.442695, %v169_v38 }
  0x96   :  { %v150_v43 = vpop.xlane.xlu0 %149  ;;  %v196_v45 = vmul.f32 1.442695, %v167_v41 }
  0x97   :  { %693 = vpow2.f32 %v200_v42  ;;  %v168_v46 = vsub.f32 %v897_v25, %v150_v43  ;;  %v144_v47 = vpop.xlane.xlu1 %143 }
  0x98   :  { %695 = vpow2.f32 %v196_v45  ;;  %v166_v48 = vsub.f32 %v911_v35, %v144_v47 }
  0x99   :  { %v198_v49 = vmul.f32 1.442695, %v168_v46 }
  0x9a   :  { %v194_v50 = vmul.f32 1.442695, %v166_v48  ;;  %v141_v51 = vpop.xlane.xlu0 %140 }
  0x9b   :  { %697 = vpow2.f32 %v198_v49  ;;  %v165_v53 = vsub.f32 %v923_v40, %v141_v51  ;;  %v138_v24 = vpop.xlane.xlu1 %137  ;;  %v801_v51 = vmov 0.0  }
  0x9c   :  { %699 = vpow2.f32 %v194_v50  ;;  %v164_v28 = vsub.f32 %v928_v44, %v138_v24  ;;  %652 = vmatprep.subr.mxu1 %v801_v51  ;;  %684 = vmatprep.mubr.msk.f32.mxu1 %vm802_vm1, %v801_v51 }
  0x9d   :  { %v192_v54 = vmul.f32 1.442695, %v165_v53 }
  0x9e   :  { %v190_v55 = vmul.f32 1.442695, %v164_v28  ;;  %v135_v57 = vpop.xlane.xlu0 %134 }
  0x9f   :  { %701 = vpow2.f32 %v192_v54  ;;  %v163_v25 = vsub.f32 %v945_v52, %v135_v57  ;;  %v132_v58 = vpop.xlane.xlu1 %131 }
  0xa0   :  { %703 = vpow2.f32 %v190_v55  ;;  %v162_v35 = vsub.f32 %v950_v56, %v132_v58  ;;  %v282_v55 = vld [vmem:[%s1211_s1] sm:$0xff] }
  0xa1   :  { %v188_v59 = vmul.f32 1.442695, %v163_v25  ;;  %646 = vmatprep.mubr.msk.f32.mxu0 %vm105_vm0, %v282_v55 }
  0xa2   :  { %v186_v60 = vmul.f32 1.442695, %v162_v35  ;;  %v129_v61 = vpop.xlane.xlu0 %128 }
  0xa3   :  { %705 = vpow2.f32 %v188_v59  ;;  %v161_v40 = vsub.f32 %v967_v0, %v129_v61  ;;  %v126_v62 = vpop.xlane.xlu1 %125 }
  0xa4   :  { %v1032_v63 = vpop.eup %693  ;;  %707 = vpow2.f32 %v186_v60  ;;  %v160_v44 = vsub.f32 %v972_v5, %v126_v62 }
  0xa5   :  { %v1035_v2 = vpop.eup %695  ;;  %v184_v3 = vmul.f32 1.442695, %v161_v40  ;;  %v247_v52 = vsel %vm105_vm0, %v1032_v63, 0.0 }
  0xa6   :  { %v182_v4 = vmul.f32 1.442695, %v160_v44  ;;  %v123_v56 = vpop.xlane.xlu0 %122  ;;  %248 = vadd.xlane.f32.xlu0 %v247_v52  ;;  %v241_v0 = vsel %vm105_vm0, %v1035_v2, 0.0 }
  0xa7   :  { %709 = vpow2.f32 %v184_v3  ;;  %v159_v6 = vsub.f32 %v989_v13, %v123_v56  ;;  %v120_v7 = vpop.xlane.xlu1 %119 }
  0xa8   :  { %v1042_v8 = vpop.eup %697  ;;  %711 = vpow2.f32 %v182_v4  ;;  %v158_v5 = vsub.f32 %v994_v17, %v120_v7 }
  0xa9   :  { %v1045_v9 = vpop.eup %699  ;;  %v180_v10 = vmul.f32 1.442695, %v159_v6  ;;  %v244_v11 = vsel %vm105_vm0, %v1042_v8, 0.0 }
  0xaa   :  { %v178_v12 = vmul.f32 1.442695, %v158_v5  ;;  %v117_v14 = vpop.xlane.xlu0 %116  ;;  %242 = vadd.xlane.f32.xlu0 %v241_v0  ;;  %245 = vadd.xlane.f32.xlu1 %v244_v11  ;;  %v238_v16 = vsel %vm105_vm0, %v1045_v9, 0.0 }
  0xab   :  { %713 = vpow2.f32 %v180_v10  ;;  %v157_v13 = vsub.f32 %v1005_v23, %v117_v14  ;;  %v114_v15 = vpop.xlane.xlu1 %113 }
  0xac   :  { %v1052_v18 = vpop.eup %701  ;;  %715 = vpow2.f32 %v178_v12  ;;  %v156_v17 = vsub.f32 %v1009_v29, %v114_v15 }
  0xad   :  { %v1055_v19 = vpop.eup %703  ;;  %v176_v20 = vmul.f32 1.442695, %v157_v13  ;;  %v235_v21 = vsel %vm105_vm0, %v1052_v18, 0.0 }
  0xae   :  { %v174_v22 = vmul.f32 1.442695, %v156_v17  ;;  %236 = vadd.xlane.f32.xlu0 %v235_v21  ;;  %v111_v26 = vpop.xlane.xlu0 %110  ;;  %239 = vadd.xlane.f32.xlu1 %v238_v16  ;;  %v232_v27 = vsel %vm105_vm0, %v1055_v19, 0.0 }
  0xaf   :  { %717 = vpow2.f32 %v176_v20  ;;  %v155_v23 = vsub.f32 %v1013_v31, %v111_v26  ;;  %v108_v30 = vpop.xlane.xlu1 %107 }
  0xb0   :  { %v1062_v1 = vpop.eup %705  ;;  %719 = vpow2.f32 %v174_v22  ;;  %v154_v29 = vsub.f32 %v1017_v33, %v108_v30 }
  0xb1   :  { %v1065_v32 = vpop.eup %707  ;;  %v172_v34 = vmul.f32 1.442695, %v155_v23  ;;  %v229_v36 = vsel %vm105_vm0, %v1062_v1, 0.0 }
  0xb2   :  { %230 = vadd.xlane.f32.xlu0 %v229_v36  ;;  %233 = vadd.xlane.f32.xlu1 %v232_v27  ;;  %v170_v37 = vmul.f32 1.442695, %v154_v29  ;;  %v226_v31 = vsel %vm105_vm0, %v1065_v32, 0.0 }
  0xb3   :  { %721 = vpow2.f32 %v172_v34 }
  0xb4   :  { %v1071_v38 = vpop.eup %709  ;;  %723 = vpow2.f32 %v170_v37 }
  0xb5   :  { %v1073_v39 = vpop.eup %711  ;;  %v223_v33 = vsel %vm105_vm0, %v1071_v38, 0.0 }
  0xb6   :  { %224 = vadd.xlane.f32.xlu0 %v223_v33  ;;  %227 = vadd.xlane.f32.xlu1 %v226_v31  ;;  %v220_v41 = vsel %vm105_vm0, %v1073_v39, 0.0  ;;  %v435_v33 = vld [vmem:[%s1212_s2] sm:$0x1]  ;;  %s803_s2 = smov [#allocation6]  }
  0xb7   :  { %s528_s20 = sshll.u32 %s803_s2, 4  ;;  %s529_s20 = int_to_ptr.vmem [resolvable:$true] %s528_s20 }
  0xb8   :  { %v1079_v42 = vpop.eup %713  ;;  %s757_s23 = scalar_lea.vmem %s529_s20, 16  ;;  %s761_s24 = scalar_lea.vmem %s529_s20, 32 }
  0xb9   :  { %v1081_v43 = vpop.eup %715  ;;  %v217_v45 = vsel %vm105_vm0, %v1079_v42, 0.0  ;;  %p758_p0 = scmp.ne.s32.totalorder %s529_s20, %s757_s23  ;;  %p762_p1 = scmp.lt.s32.totalorder %s529_s20, %s529_s20 }
  0xba   :  { %218 = vadd.xlane.f32.xlu0 %v217_v45  ;;  %221 = vadd.xlane.f32.xlu1 %v220_v41  ;;  %v214_v46 = vsel %vm105_vm0, %v1081_v43, 0.0  ;;  %v283_v41 = vld [vmem:[%s1211_s1 + $0x8] sm:$0xff]  ;;  %p763_p2 = scmp.lt.s32.totalorder %s761_s24, %s757_s23 }
  0xbc   :  { %v1087_v47 = vpop.eup %717  ;;  %p764_p3 = por %p763_p2, %p762_p1 }
  0xbd   :  { %v1089_v48 = vpop.eup %719  ;;  %v211_v49 = vsel %vm105_vm0, %v1087_v47, 0.0 }
  0xbe   :  { %212 = vadd.xlane.f32.xlu0 %v211_v49  ;;  %215 = vadd.xlane.f32.xlu1 %v214_v46  ;;  %v208_v50 = vsel %vm105_vm0, %v1089_v48, 0.0  ;;  %p765_p4 = pnand %p764_p3, %p758_p0 }
  0xc0   :  { %v1096_v53 = vpop.eup %721 }
  0xc1   :  { %v1098_v24 = vpop.eup %723  ;;  %v205_v28 = vsel %vm105_vm0, %v1096_v53, 0.0 }
  0xc2   :  { %206 = vadd.xlane.f32.xlu0 %v205_v28  ;;  %209 = vadd.xlane.f32.xlu1 %v208_v50  ;;  %v202_v54 = vsel %vm105_vm0, %v1098_v24, 0.0 }
  0xc6   :  { %203 = vadd.xlane.f32.xlu1 %v202_v54 }
 0x12f   :  { %v249_v57 = vpop.xlane.xlu0 %248 }
 0x130   :  { %725 = vrcp.f32 %v249_v57 }
 0x133   :  { %v243_v25 = vpop.xlane.xlu0 %242  ;;  %v246_v58 = vpop.xlane.xlu1 %245 }
 0x134   :  { %727 = vrcp.f32 %v243_v25 }
 0x135   :  { %729 = vrcp.f32 %v246_v58 }
 0x137   :  { %v240_v35 = vpop.xlane.xlu1 %239  ;;  %v237_v59 = vpop.xlane.xlu0 %236 }
 0x138   :  { %731 = vrcp.f32 %v240_v35 }
 0x139   :  { %733 = vrcp.f32 %v237_v59 }
 0x13b   :  { %v234_v61 = vpop.xlane.xlu1 %233  ;;  %v231_v3 = vpop.xlane.xlu0 %230 }
 0x13c   :  { %735 = vrcp.f32 %v234_v61 }
 0x13d   :  { %v726_v60 = vpop.eup %725  ;;  %737 = vrcp.f32 %v231_v3 }
 0x13e   :  { %v281_v40 = vmul.f32 %v726_v60, %v1032_v63 }
 0x13f   :  { %v228_v56 = vpop.xlane.xlu1 %227  ;;  %v225_v0 = vpop.xlane.xlu0 %224 }
 0x140   :  { %614 = vmatprep.subr.msk.mxu0 %vm105_vm0, %v281_v40  ;;  %653 = vmatpush3.xpose.msk.msra.mxu1 %vm105_vm0, %v281_v40  ;;  %739 = vrcp.f32 %v228_v56 }
 0x141   :  { %v728_v62 = vpop.eup %727  ;;  %615 = vmatpush3.xpose.msk.msra.mxu0 %vm105_vm0, %v281_v40  ;;  %654 = vmatprep.subr.mxu1 %v801_v51  ;;  %741 = vrcp.f32 %v225_v0 }
 0x142   :  { %v730_v44 = vpop.eup %729  ;;  %v277_v63 = vmul.f32 %v728_v62, %v1035_v2 }
 0x143   :  { %v279_v52 = vmul.f32 %v730_v44, %v1042_v8  ;;  %v222_v5 = vpop.xlane.xlu1 %221  ;;  %v219_v11 = vpop.xlane.xlu0 %218 }
 0x144   :  { %743 = vrcp.f32 %v222_v5 }
 0x145   :  { %616 = vmatprep.subr.msk.mxu0 %vm105_vm0, %v279_v52  ;;  %655 = vmatpush3.xpose.msk.msra.mxu1 %vm105_vm0, %v279_v52  ;;  %v732_v4 = vpop.eup %731  ;;  %745 = vrcp.f32 %v219_v11 }
 0x146   :  { %617 = vmatpush3.xpose.msk.msra.mxu0 %vm105_vm0, %v279_v52  ;;  %656 = vmatprep.subr.mxu1 %v801_v51  ;;  %v275_v6 = vmul.f32 %v732_v4, %v1045_v9  ;;  %v734_v7 = vpop.eup %733 }
 0x147   :  { %618 = vmatprep.subr.msk.mxu0 %vm105_vm0, %v277_v63  ;;  %v273_v2 = vmul.f32 %v734_v7, %v1052_v18  ;;  %v216_v13 = vpop.xlane.xlu1 %215  ;;  %v213_v18 = vpop.xlane.xlu0 %212 }
 0x148   :  { %747 = vrcp.f32 %v216_v13 }
 0x149   :  { %657 = vmatpush3.xpose.msk.msra.mxu1 %vm105_vm0, %v277_v63  ;;  %v736_v8 = vpop.eup %735  ;;  %749 = vrcp.f32 %v213_v18 }
 0x14a   :  { %619 = vmatpush3.xpose.msk.msra.mxu0 %vm105_vm0, %v277_v63  ;;  %658 = vmatprep.subr.mxu1 %v801_v51  ;;  %v271_v9 = vmul.f32 %v736_v8, %v1055_v19  ;;  %v738_v10 = vpop.eup %737 }
 0x14b   :  { %620 = vmatprep.subr.msk.mxu0 %vm105_vm0, %v275_v6  ;;  %v269_v12 = vmul.f32 %v738_v10, %v1062_v1  ;;  %v210_v20 = vpop.xlane.xlu1 %209  ;;  %v207_v26 = vpop.xlane.xlu0 %206 }
 0x14c   :  { %751 = vrcp.f32 %v210_v20 }
 0x14d   :  { %659 = vmatpush3.xpose.msk.msra.mxu1 %vm105_vm0, %v275_v6  ;;  %v740_v14 = vpop.eup %739  ;;  %753 = vrcp.f32 %v207_v26 }
 0x14e   :  { %621 = vmatpush3.xpose.msk.msra.mxu0 %vm105_vm0, %v275_v6  ;;  %660 = vmatprep.subr.mxu1 %v801_v51  ;;  %v267_v15 = vmul.f32 %v740_v14, %v1065_v32  ;;  %v742_v16 = vpop.eup %741 }
 0x14f   :  { %622 = vmatprep.subr.msk.mxu0 %vm105_vm0, %v273_v2  ;;  %v265_v17 = vmul.f32 %v742_v16, %v1071_v38  ;;  %v204_v30 = vpop.xlane.xlu1 %203 }
 0x150   :  { %755 = vrcp.f32 %v204_v30 }
 0x151   :  { %661 = vmatpush3.xpose.msk.msra.mxu1 %vm105_vm0, %v273_v2  ;;  %v744_v19 = vpop.eup %743 }
 0x152   :  { %623 = vmatpush3.xpose.msk.msra.mxu0 %vm105_vm0, %v273_v2  ;;  %662 = vmatprep.subr.mxu1 %v801_v51  ;;  %v263_v21 = vmul.f32 %v744_v19, %v1073_v39  ;;  %v746_v22 = vpop.eup %745 }
 0x153   :  { %624 = vmatprep.subr.msk.mxu0 %vm105_vm0, %v271_v9  ;;  %v261_v23 = vmul.f32 %v746_v22, %v1079_v42  ;;  %v284_v42 = vld [vmem:[%s1211_s1 + $0x10] sm:$0xff] }
 0x155   :  { %663 = vmatpush3.xpose.msk.msra.mxu1 %vm105_vm0, %v271_v9  ;;  %v748_v27 = vpop.eup %747 }
 0x156   :  { %625 = vmatpush3.xpose.msk.msra.mxu0 %vm105_vm0, %v271_v9  ;;  %664 = vmatprep.subr.mxu1 %v801_v51  ;;  %v259_v1 = vmul.f32 %v748_v27, %v1081_v43  ;;  %v750_v29 = vpop.eup %749  ;;  %v285_v43 = vld [vmem:[%s1211_s1 + $0x18] sm:$0xff] }
 0x157   :  { %626 = vmatprep.subr.msk.mxu0 %vm105_vm0, %v269_v12  ;;  %v257_v32 = vmul.f32 %v750_v29, %v1087_v47 }
 0x159   :  { %665 = vmatpush3.xpose.msk.msra.mxu1 %vm105_vm0, %v269_v12  ;;  %v752_v34 = vpop.eup %751 }
 0x15a   :  { %627 = vmatpush3.xpose.msk.msra.mxu0 %vm105_vm0, %v269_v12  ;;  %666 = vmatprep.subr.mxu1 %v801_v51  ;;  %v255_v36 = vmul.f32 %v752_v34, %v1089_v48  ;;  %v754_v37 = vpop.eup %753 }
 0x15b   :  { %628 = vmatprep.subr.msk.mxu0 %vm105_vm0, %v267_v15  ;;  %v253_v31 = vmul.f32 %v754_v37, %v1096_v53 }
 0x15d   :  { %667 = vmatpush3.xpose.msk.msra.mxu1 %vm105_vm0, %v267_v15  ;;  %v756_v38 = vpop.eup %755 }
 0x15e   :  { %629 = vmatpush3.xpose.msk.msra.mxu0 %vm105_vm0, %v267_v15  ;;  %668 = vmatprep.subr.mxu1 %v801_v51  ;;  %v251_v39 = vmul.f32 %v756_v38, %v1098_v24 }
 0x15f   :  { %630 = vmatprep.subr.msk.mxu0 %vm105_vm0, %v265_v17 }
 0x161   :  { %669 = vmatpush3.xpose.msk.msra.mxu1 %vm105_vm0, %v265_v17 }
 0x162   :  { %631 = vmatpush3.xpose.msk.msra.mxu0 %vm105_vm0, %v265_v17  ;;  %670 = vmatprep.subr.mxu1 %v801_v51 }
 0x163   :  { %632 = vmatprep.subr.msk.mxu0 %vm105_vm0, %v263_v21 }
 0x165   :  { %671 = vmatpush3.xpose.msk.msra.mxu1 %vm105_vm0, %v263_v21 }
 0x166   :  { %633 = vmatpush3.xpose.msk.msra.mxu0 %vm105_vm0, %v263_v21  ;;  %672 = vmatprep.subr.mxu1 %v801_v51 }
 0x167   :  { %634 = vmatprep.subr.msk.mxu0 %vm105_vm0, %v261_v23 }
 0x169   :  { %673 = vmatpush3.xpose.msk.msra.mxu1 %vm105_vm0, %v261_v23 }
 0x16a   :  { %635 = vmatpush3.xpose.msk.msra.mxu0 %vm105_vm0, %v261_v23  ;;  %674 = vmatprep.subr.mxu1 %v801_v51 }
 0x16b   :  { %636 = vmatprep.subr.msk.mxu0 %vm105_vm0, %v259_v1 }
 0x16d   :  { %675 = vmatpush3.xpose.msk.msra.mxu1 %vm105_vm0, %v259_v1 }
 0x16e   :  { %637 = vmatpush3.xpose.msk.msra.mxu0 %vm105_vm0, %v259_v1  ;;  %676 = vmatprep.subr.mxu1 %v801_v51 }
 0x16f   :  { %638 = vmatprep.subr.msk.mxu0 %vm105_vm0, %v257_v32 }
 0x171   :  { %677 = vmatpush3.xpose.msk.msra.mxu1 %vm105_vm0, %v257_v32 }
 0x172   :  { %639 = vmatpush3.xpose.msk.msra.mxu0 %vm105_vm0, %v257_v32  ;;  %678 = vmatprep.subr.mxu1 %v801_v51 }
 0x173   :  { %640 = vmatprep.subr.msk.mxu0 %vm105_vm0, %v255_v36 }
 0x175   :  { %679 = vmatpush3.xpose.msk.msra.mxu1 %vm105_vm0, %v255_v36 }
 0x176   :  { %641 = vmatpush3.xpose.msk.msra.mxu0 %vm105_vm0, %v255_v36  ;;  %680 = vmatprep.subr.mxu1 %v801_v51 }
 0x177   :  { %642 = vmatprep.subr.msk.mxu0 %vm105_vm0, %v253_v31 }
 0x179   :  { %681 = vmatpush3.xpose.msk.msra.mxu1 %vm105_vm0, %v253_v31 }
 0x17a   :  { %643 = vmatpush3.xpose.msk.msra.mxu0 %vm105_vm0, %v253_v31  ;;  %682 = vmatprep.subr.mxu1 %v801_v51 }
 0x17b   :  { %644 = vmatprep.subr.msk.mxu0 %vm105_vm0, %v251_v39 }
 0x17d   :  { %683 = vmatpush3.xpose.msk.msra.mxu1 %vm105_vm0, %v251_v39 }
 0x17e   :  { %645 = vmatpush3.xpose.msk.msra.mxu0 %vm105_vm0, %v251_v39 }
 0x180   :  { %685 = vmatmul.mubr.msk.f32.vlgmr.msra.gmra.mxu1 %vm105_vm0, %v435_v33 }
 0x181   :  { %647 = vmatmul.mubr.msk.f32.vlgmr.msra.gmra.mxu0 %vm105_vm0, %v283_v41 }
 0x182   :  { %649 = vmatprep.mubr.msk.f32.mxu0 %vm105_vm0, %v284_v42 }
 0x185   :  { %650 = vmatmul.mubr.msk.f32.gmra.mxu0 %vm105_vm0, %v285_v43 }
 0x240   :  { %v505_v45 = vpop.f32.mrf.mxu1 }
 0x241   :  { %v648_v46 = vpop.f32.mrf.mxu0  ;;  %509 = vst [vmem:[#allocation6] sm:$0x1] %v505_v45 }
 0x242   :  { %432 = vst [vmem:[#allocation4 + $0x8] sm:$0xff] %v648_v46  ;;  %v686_v47 = vpop.f32.mrf.mxu1 }
 0x243   :  { %768 = shalt.err (!%p765_p4)
}
 0x244   :  { %531 = dma.vmem_to_hbm [thread:$0]  %s529_s20, 16, %s1216_s6, [#allocation7]   ;;  %v412_v48 = vpop.f32.mrf.mxu0 }
 0x245   :  { %431 = vst [vmem:[#allocation4] sm:$0xff] %v412_v48  ;;  %s777_s26 = scalar_lea.vmem %s516_s22, 512  ;;  %p782_p6 = scmp.lt.s32.totalorder %s516_s22, %s516_s22 }
 0x246   :  { %v651_v49 = vpop.f32.mrf.mxu0  ;;  %p778_p5 = scmp.ne.s32.totalorder %s516_s22, %s777_s26  ;;  %p783_p7 = scmp.lt.s32.totalorder %s777_s26, %s777_s26 }
 0x247   :  { %434 = vst [vmem:[#allocation4 + $0x18] sm:$0xff] %v651_v49 }
 0x248   :  { %v422_v50 = vpop.f32.mrf.mxu0  ;;  %p784_p8 = por %p783_p7, %p782_p6 }
 0x249   :  { %433 = vst [vmem:[#allocation4 + $0x10] sm:$0xff] %v422_v50 }
 0x24a   :  { %p785_p9 = pnand %p784_p8, %p778_p5 }
 0x24c   :  { %788 = shalt.err (!%p785_p9)
}
 0x24d   :  { %s805_s27 = smov 128   ;;  %s806_s28 = smov 8  }
 0x24e   :  { %521 = dma.vmem_to_hbm [thread:$0]  %s516_s22, 512, %s1215_s5, [#allocation5], %s805_s27, %s805_s27, %s806_s28  }
 0x24f   :  { %797 = dma.done.wait [#allocation5], 512  }
 0x250   :  { %798 = vsyncadd [#allocation5], 4294966784 }
 0x251   :  { %799 = dma.done.wait [#allocation7], 16  }
 0x252   :  { %800 = vsyncadd [#allocation7], 4294967280 }
 0x253   :  { %538 = vsyncpa [#allocation5], 1 }
 0x254   :  { %539 = vsyncpa [#allocation7], 1 }

</bundles_post_ra>
